<compile_context>
chip_gen: v7x
topology: tpu7x:2x2x1
jax: 0.10.0
libtpu: 0.0.40
codegen_flags: <defaults>
</compile_context>

<pallas_src>
import functools

import jax
import jax.numpy as jnp
from jax import lax
from jax.experimental import pallas as pl
from jax.experimental.pallas import tpu as pltpu


def _distill_kl_kernel(y_s_ref, y_t_ref, out_ref, *, inv_t, batch_size,
                       block_rows, needs_mask):
    i = pl.program_id(0)

    # One (TB, C) tile of student / teacher logits, scaled by 1/T (mul, not div).
    s = y_s_ref[...].astype(jnp.float32) * inv_t
    t = y_t_ref[...].astype(jnp.float32) * inv_t

    # Numerically-stable shifts along the class (lane) dim.
    s_shift = s - jnp.max(s, axis=-1, keepdims=True)
    t_shift = t - jnp.max(t, axis=-1, keepdims=True)

    e_s = jnp.exp(s_shift)
    e_t = jnp.exp(t_shift)

    z_s = jnp.sum(e_s, axis=-1, keepdims=True)                      # (TB, 1)
    z_t = jnp.sum(e_t, axis=-1, keepdims=True)                      # (TB, 1)
    num = jnp.sum(e_t * (t_shift - s_shift), axis=-1, keepdims=True)  # (TB, 1)

    # row_kl = sum_j p_t_j * (log p_t_j - log p_s_j)
    #        = (1/Z_t) * sum_j e_t_j * (t_shift_j - s_shift_j) + (lse_s - lse_t)
    # (uses sum_j p_t_j == 1).  Only (TB, 1) divides / logs remain.
    row_kl = num / z_t + (jnp.log(z_s) - jnp.log(z_t))               # (TB, 1)

    if needs_mask:
        # Rows past the true batch size hold undefined padding.  Mask the
        # *reduced* per-row KL with a select (NOT a multiply) so NaN/Inf
        # garbage in padded rows cannot leak into the block partial sum.
        row_ids = i * block_rows + lax.broadcasted_iota(
            jnp.int32, (block_rows, 1), 0)
        row_kl = jnp.where(row_ids < batch_size, row_kl, 0.0)

    out_ref[0, 0] = jnp.sum(row_kl)


def _round_up_8(n):
    return max(8, ((n + 7) // 8) * 8)


def _choose_block_rows(B, C):
    # ~4 MiB of f32 per input buffer: 2 inputs x 2 pipeline buffers ~ 16 MiB of
    # VMEM plus a handful of (TB, C) temporaries — inside a 48 MiB scoped
    # budget on v5e/v6e/v7x, and large enough that the ~0.35 us per-grid-step
    # overhead is a small fraction of the per-step DMA time.
    target_elems = (4 * 1024 * 1024) // 4
    tb = target_elems // max(C, 1)
    tb = max(8, (tb // 8) * 8)          # sublane multiple
    if B > 8:
        # Keep at least 2 blocks so the "parallel" grid axis can shard the
        # batch across both v7x TensorCores (harmless on single-TC parts).
        tb = min(tb, _round_up_8(-(-B // 2)))
    return min(tb, _round_up_8(B))


def distill_kl(y_s, y_t, T, block_rows=None):
    """Pallas implementation of DistillKL(T).forward(y_s, y_t)."""
    assert y_s.shape == y_t.shape and y_s.ndim == 2
    B, C = y_s.shape
    TB = _choose_block_rows(B, C) if block_rows is None else min(block_rows, B)
    num_blocks = pl.cdiv(B, TB)
    needs_mask = (num_blocks * TB != B)

    kernel = functools.partial(
        _distill_kl_kernel,
        inv_t=1.0 / float(T),
        batch_size=B,
        block_rows=TB,
        needs_mask=needs_mask,
    )

    bytes_accessed = (y_s.size * y_s.dtype.itemsize
                      + y_t.size * y_t.dtype.itemsize
                      + num_blocks * 4)
    cost = pl.CostEstimate(
        flops=10 * B * C,            # scale, shift, diff, product, reductions
        transcendentals=2 * B * C,   # one exp per student + teacher element
        bytes_accessed=bytes_accessed,
    )

    partials = pl.pallas_call(
        kernel,
        out_shape=jax.ShapeDtypeStruct((num_blocks, 1), jnp.float32),
        grid=(num_blocks,),
        in_specs=[
            pl.BlockSpec((TB, C), lambda i: (i, 0)),
            pl.BlockSpec((TB, C), lambda i: (i, 0)),
        ],
        # Per-block partial scalar sums -> SMEM; "parallel" axis lets the two
        # v7x TensorCores stream independent batch tiles concurrently.
        out_specs=pl.BlockSpec((1, 1), lambda i: (i, 0),
                               memory_space=pltpu.MemorySpace.SMEM),
        compiler_params=pltpu.CompilerParams(
            dimension_semantics=("parallel",),
            vmem_limit_bytes=48 * 1024 * 1024,
        ),
        cost_estimate=cost,
    )(y_s, y_t)

    # kl_div(log_p_s, p_t, reduction='batchmean') * T^2
    scale = (float(T) * float(T)) / float(B)
    return jnp.sum(partials) * scale


def _distill_kl_ref(y_s, y_t, T):
    """Pure-JAX reference matching PyTorch semantics."""
    log_p_s = jax.nn.log_softmax(y_s.astype(jnp.float32) / T, axis=1)
    log_p_t = jax.nn.log_softmax(y_t.astype(jnp.float32) / T, axis=1)
    p_t = jnp.exp(log_p_t)
    kl = jnp.sum(p_t * (log_p_t - log_p_s)) / y_s.shape[0]
    return kl * T ** 2


if __name__ == "__main__":
    key = jax.random.PRNGKey(0)
    k1, k2, k3, k4 = jax.random.split(key, 4)

    # Primary case: CIFAR-100 style logits, batch=8, num_classes=100, T=4.
    B, C, T = 8, 100, 4.0
    y_s = jax.random.normal(k1, (B, C), dtype=jnp.float32) * 2.0
    y_t = jax.random.normal(k2, (B, C), dtype=jnp.float32) * 2.0
    loss = jax.block_until_ready(distill_kl(y_s, y_t, T))
    loss_ref = jax.block_until_ready(_distill_kl_ref(y_s, y_t, T))
    assert jnp.allclose(loss, loss_ref, rtol=1e-5, atol=1e-5), (loss, loss_ref)

    # Secondary case: exercises the multi-block grid + ragged-last-block
    # masking path (B=20 with TB=8 -> 3 grid steps, last block padded).
    B2, C2 = 20, 100
    y_s2 = jax.random.normal(k3, (B2, C2), dtype=jnp.float32) * 2.0
    y_t2 = jax.random.normal(k4, (B2, C2), dtype=jnp.float32) * 2.0
    loss2 = jax.block_until_ready(distill_kl(y_s2, y_t2, T, block_rows=8))
    loss2_ref = jax.block_until_ready(_distill_kl_ref(y_s2, y_t2, T))
    assert jnp.allclose(loss2, loss2_ref, rtol=1e-5, atol=1e-5), (loss2, loss2_ref)

    # bf16 logits (the common training case) also go through the same kernel;
    # the kernel upcasts internally, halving HBM traffic on bandwidth-bound gens.
    loss3 = jax.block_until_ready(
        distill_kl(y_s.astype(jnp.bfloat16), y_t.astype(jnp.bfloat16), T))
    loss3_ref = jax.block_until_ready(
        _distill_kl_ref(y_s.astype(jnp.bfloat16), y_t.astype(jnp.bfloat16), T))
    assert jnp.allclose(loss3, loss3_ref, rtol=2e-2, atol=2e-2), (loss3, loss3_ref)

    print("KERNEL_OK")
</pallas_src>

<mosaic_0001>
module attributes {stable_mosaic.version = 11 : i64} {
  func.func @_distill_kl_kernel(%arg0: i32, %arg1: memref<8x100xf32, #tpu.memory_space<vmem>>, %arg2: memref<8x100xf32, #tpu.memory_space<vmem>>, %arg3: memref<1x1xf32, #tpu.memory_space<smem>>) attributes {dimension_semantics = [#tpu.dimension_semantics<parallel>], iteration_bounds = array<i64: 1>, scalar_prefetch = 0 : i64, scratch_operands = 0 : i64, tpu.core_type = #tpu.core_type<tc>, window_params = [{transform_indices = @transform_0, window_bounds = array<i64: 8, 100>}, {transform_indices = @transform_1, window_bounds = array<i64: 8, 100>}, {transform_indices = @transform_2, window_bounds = array<i64: 1, 1>}]} {
    %c0 = arith.constant 0 : index
    %c0_0 = arith.constant 0 : index
    %0 = vector.load %arg1[%c0, %c0_0] : memref<8x100xf32, #tpu.memory_space<vmem>>, vector<8x100xf32>
    %cst = arith.constant 2.500000e-01 : f32
    %1 = vector.broadcast %cst : f32 to vector<8x100xf32>
    %2 = arith.mulf %0, %1 : vector<8x100xf32>
    %c0_1 = arith.constant 0 : index
    %c0_2 = arith.constant 0 : index
    %3 = vector.load %arg2[%c0_1, %c0_2] : memref<8x100xf32, #tpu.memory_space<vmem>>, vector<8x100xf32>
    %cst_3 = arith.constant 2.500000e-01 : f32
    %4 = vector.broadcast %cst_3 : f32 to vector<8x100xf32>
    %5 = arith.mulf %3, %4 : vector<8x100xf32>
    %cst_4 = arith.constant dense<0xFF800000> : vector<8xf32>
    %6 = vector.multi_reduction <maximumf>, %2, %cst_4 [1] : vector<8x100xf32> to vector<8xf32>
    %7 = vector.shape_cast %6 : vector<8xf32> to vector<8x1xf32>
    %8 = vector.broadcast %7 : vector<8x1xf32> to vector<8x100xf32>
    %9 = arith.subf %2, %8 : vector<8x100xf32>
    %cst_5 = arith.constant dense<0xFF800000> : vector<8xf32>
    %10 = vector.multi_reduction <maximumf>, %5, %cst_5 [1] : vector<8x100xf32> to vector<8xf32>
    %11 = vector.shape_cast %10 : vector<8xf32> to vector<8x1xf32>
    %12 = vector.broadcast %11 : vector<8x1xf32> to vector<8x100xf32>
    %13 = arith.subf %5, %12 : vector<8x100xf32>
    %14 = math.exp %9 : vector<8x100xf32>
    %15 = math.exp %13 : vector<8x100xf32>
    %cst_6 = arith.constant dense<0.000000e+00> : vector<8xf32>
    %16 = vector.multi_reduction <add>, %14, %cst_6 [1] : vector<8x100xf32> to vector<8xf32>
    %17 = vector.shape_cast %16 : vector<8xf32> to vector<8x1xf32>
    %cst_7 = arith.constant dense<0.000000e+00> : vector<8xf32>
    %18 = vector.multi_reduction <add>, %15, %cst_7 [1] : vector<8x100xf32> to vector<8xf32>
    %19 = vector.shape_cast %18 : vector<8xf32> to vector<8x1xf32>
    %20 = arith.subf %13, %9 : vector<8x100xf32>
    %21 = arith.mulf %15, %20 : vector<8x100xf32>
    %cst_8 = arith.constant dense<0.000000e+00> : vector<8xf32>
    %22 = vector.multi_reduction <add>, %21, %cst_8 [1] : vector<8x100xf32> to vector<8xf32>
    %23 = vector.shape_cast %22 : vector<8xf32> to vector<8x1xf32>
    %24 = arith.divf %23, %19 : vector<8x1xf32>
    %25 = math.log %17 : vector<8x1xf32>
    %26 = math.log %19 : vector<8x1xf32>
    %27 = arith.subf %25, %26 : vector<8x1xf32>
    %28 = arith.addf %24, %27 : vector<8x1xf32>
    %29 = vector.shape_cast %28 : vector<8x1xf32> to vector<1x8x1xf32>
    %cst_9 = arith.constant dense<0.000000e+00> : vector<1xf32>
    %30 = vector.multi_reduction <add>, %29, %cst_9 [1, 2] : vector<1x8x1xf32> to vector<1xf32>
    %31 = vector.shape_cast %30 : vector<1xf32> to vector<1x1x1xf32>
    %32 = vector.extract %31[0, 0, 0] : f32 from vector<1x1x1xf32>
    %c0_10 = arith.constant 0 : index
    %c0_11 = arith.constant 0 : index
    %33 = memref.load %arg3[%c0_10, %c0_11] : memref<1x1xf32, #tpu.memory_space<smem>>
    memref.store %32, %arg3[%c0_10, %c0_11] : memref<1x1xf32, #tpu.memory_space<smem>>
    return
  }
  func.func @transform_0(%arg0: i32) -> (i32, i32) {
    %c0_i32 = arith.constant 0 : i32
    %c0_i32_0 = arith.constant 0 : i32
    return %arg0, %c0_i32 : i32, i32
  }
  func.func @transform_1(%arg0: i32) -> (i32, i32) {
    %c0_i32 = arith.constant 0 : i32
    %c0_i32_0 = arith.constant 0 : i32
    return %arg0, %c0_i32 : i32, i32
  }
  func.func @transform_2(%arg0: i32) -> (i32, i32) {
    %c0_i32 = arith.constant 0 : i32
    %c0_i32_0 = arith.constant 0 : i32
    return %arg0, %c0_i32 : i32, i32
  }
}

</mosaic_0001>

<bundles_post_ra>
// kernel: tpu_custom_call.1
= control target key start
LH: loop header
LB: loop body
LE: loop exit
PB: predicated region body
PF: predicated region fallthrough
CT: control target
= control target key end

     0   :  { %7 = vsyncpa [#allocation3], 0  ;;  %s234_s0 = inlined_call_operand.hbm [shape: f32[8,100], index: 0, kind: input, shape index: {}]   ;;  %s235_s1 = inlined_call_operand.hbm [shape: f32[8,100], index: 1, kind: input, shape index: {}]   ;;  %s236_s2 = inlined_call_operand.hbm [shape: f32[1,1], index: 2, kind: output, shape index: {}]  }
   0x1   :  { %8 = vsyncpa [#allocation6], 0 }
   0x2   :  { %9 = vsyncpa [#allocation4], 0  ;;  %s175_s9 = smov [#allocation2]   ;;  %s176_s11 = smov [#allocation5]  }
   0x3   :  { %s16_s10 = sshll.u32 %s175_s9, 4  ;;  %s26_s12 = sshll.u32 %s176_s11, 4  ;;  %s17_s10 = int_to_ptr.vmem [resolvable:$true] %s16_s10  ;;  %s27_s12 = int_to_ptr.vmem [resolvable:$true] %s26_s12 }
   0x4   :  { %s115_s15 = scalar_lea.hbm %s234_s0, 128 }
   0x5   :  { %p116_p0 = scmp.ne.s32.totalorder %s234_s0, %s115_s15  ;;  %p119_p1 = scmp.lt.u32.totalorder %s115_s15, %s234_s0 }
   0x7   :  { %p121_p2 = pnand %p119_p1, %p116_p0 }
   0x9   :  { %124 = shalt.err (!%p121_p2)
}
   0xa   :  { %s125_s20 = scalar_lea.vmem %s17_s10, 128  ;;  %p130_p4 = scmp.lt.s32.totalorder %s17_s10, %s17_s10 }
   0xb   :  { %p126_p3 = scmp.ne.s32.totalorder %s17_s10, %s125_s20  ;;  %p131_p5 = scmp.lt.s32.totalorder %s125_s20, %s125_s20 }
   0xd   :  { %p132_p6 = por %p131_p5, %p130_p4 }
   0xf   :  { %p133_p7 = pnand %p132_p6, %p126_p3 }
  0x11   :  { %136 = shalt.err (!%p133_p7)
}
  0x12   :  { %19 = dma.hbm_to_vmem [thread:$0]  %s234_s0, 128, %s17_s10, [#allocation3]  }
  0x13   :  { %s137_s25 = scalar_lea.hbm %s235_s1, 128 }
  0x14   :  { %p138_p8 = scmp.ne.s32.totalorder %s235_s1, %s137_s25  ;;  %p141_p9 = scmp.lt.u32.totalorder %s137_s25, %s235_s1 }
  0x16   :  { %p143_p10 = pnand %p141_p9, %p138_p8 }
  0x18   :  { %146 = shalt.err (!%p143_p10)
}
  0x19   :  { %s147_s30 = scalar_lea.vmem %s27_s12, 128  ;;  %p152_p12 = scmp.lt.s32.totalorder %s27_s12, %s27_s12 }
  0x1a   :  { %p148_p11 = scmp.ne.s32.totalorder %s27_s12, %s147_s30  ;;  %p153_p13 = scmp.lt.s32.totalorder %s147_s30, %s147_s30 }
  0x1c   :  { %p154_p0 = por %p153_p13, %p152_p12 }
  0x1e   :  { %p155_p1 = pnand %p154_p0, %p148_p11 }
  0x20   :  { %158 = shalt.err (!%p155_p1)
}
  0x21   :  { %29 = dma.hbm_to_vmem [thread:$0]  %s235_s1, 128, %s27_s12, [#allocation6]  }
  0x22   :  { %169 = dma.done.wait [#allocation3], 128  }
  0x23   :  { %170 = vsyncadd [#allocation3], 4294967168 }
  0x24   :  { %171 = dma.done.wait [#allocation6], 128  }
  0x25   :  { %172 = vsyncadd [#allocation6], 4294967168  ;;  %v36_v0 = vld [vmem:[#allocation2] sm:$0xff]  ;;  %vm40_vm0 = vcmask 818176   ;;  %v38_v1 = vld [vmem:[#allocation5] sm:$0xff]  ;;  %vm72_vm1 = vcmask 7168  }
  0x26   :  { %v37_v2 = vmul.f32 0.25, %v36_v0  ;;  %v39_v3 = vmul.f32 0.25, %v38_v1  ;;  %s159_s6 = scalar_lea.hbm %s236_s2, 16 }
  0x27   :  { %p160_p2 = scmp.ne.s32.totalorder %s236_s2, %s159_s6  ;;  %p163_p3 = scmp.lt.u32.totalorder %s159_s6, %s236_s2 }
  0x28   :  { %v41_v4 = vsel %vm40_vm0, %v37_v2, -inf  ;;  %v45_v5 = vsel %vm40_vm0, %v39_v3, -inf }
  0x29   :  { %42 = vmax.xlane.f32.xlu0 %v41_v4  ;;  %p165_p4 = pnand %p163_p3, %p160_p2 }
  0x2d   :  { %46 = vmax.xlane.f32.xlu0 %v45_v5 }
  0xb6   :  { %v43_v6 = vpop.xlane.xlu0 %42 }
  0xb7   :  { %v44_v7 = vsub.f32 %v37_v2, %v43_v6 }
  0xb9   :  { %v49_v8 = vmul.f32 1.442695, %v44_v7 }
  0xba   :  { %v47_v9 = vpop.xlane.xlu0 %46 }
  0xbb   :  { %105 = vpow2.f32 %v49_v8  ;;  %v48_v10 = vsub.f32 %v39_v3, %v47_v9 }
  0xbd   :  { %v51_v11 = vmul.f32 1.442695, %v48_v10  ;;  %v59_v14 = vsub.f32 %v48_v10, %v44_v7 }
  0xbf   :  { %107 = vpow2.f32 %v51_v11 }
  0xc5   :  { %v106_v12 = vpop.eup %105 }
  0xc6   :  { %v53_v13 = vsel %vm40_vm0, %v106_v12, 0.0 }
  0xc7   :  { %54 = vadd.xlane.f32.xlu1 %v53_v13 }
  0xc9   :  { %v108_v15 = vpop.eup %107 }
  0xca   :  { %v56_v16 = vsel %vm40_vm0, %v108_v15, 0.0  ;;  %v60_v17 = vmul.f32 %v108_v15, %v59_v14 }
  0xcb   :  { %57 = vadd.xlane.f32.xlu1 %v56_v16 }
  0xcc   :  { %v61_v18 = vsel %vm40_vm0, %v60_v17, 0.0 }
  0xcd   :  { %62 = vadd.xlane.f32.xlu0 %v61_v18 }
 0x154   :  { %v55_v19 = vpop.xlane.xlu1 %54 }
 0x155   :  { %109 = vlog2.f32 %v55_v19 }
 0x158   :  { %v58_v20 = vpop.xlane.xlu1 %57 }
 0x159   :  { %111 = vrcp.f32 %v58_v20 }
 0x15a   :  { %113 = vlog2.f32 %v58_v20  ;;  %v63_v26 = vpop.xlane.xlu0 %62 }
 0x15f   :  { %v110_v21 = vpop.eup %109 }
 0x160   :  { %v67_v24 = vmul.f32 0.6931472, %v110_v21 }
 0x163   :  { %v112_v22 = vpop.eup %111 }
 0x164   :  { %v114_v23 = vpop.eup %113  ;;  %v65_v27 = vmul.f32 %v112_v22, %v63_v26 }
 0x165   :  { %v69_v25 = vmul.f32 0.6931472, %v114_v23 }
 0x167   :  { %v70_v28 = vsub.f32 %v67_v24, %v69_v25 }
 0x169   :  { %v71_v29 = vadd.f32 %v70_v28, %v65_v27 }
 0x16b   :  { %v73_v30 = vsel %vm72_vm1, %v71_v29, 0.0 }
 0x16c   :  { %74 = vadd.xlane.f32.xlu1 %v73_v30 }
 0x1f9   :  { %v75_v31 = vpop.xlane.xlu1 %74 }
 0x1fa   :  { %v76_v32 = vrot.slane %v75_v31, 4 }
 0x1fc   :  { %v77_v33 = vadd.f32 %v76_v32, %v75_v31 }
 0x1fe   :  { %v78_v34 = vrot.slane %v77_v33, 2 }
 0x200   :  { %v79_v35 = vadd.f32 %v78_v34, %v77_v33 }
 0x202   :  { %v80_v36 = vrot.slane %v79_v35, 1 }
 0x204   :  { %v81_v37 = vadd.f32 %v80_v36, %v79_v35 }
 0x206   :  { %100 = vpush %v81_v37 }
 0x237   :  { %s101_s1 = spop %100 }
 0x238   :  { %84 = sst [smem:[#allocation7]] %s101_s1 }
 0x239   :  { %168 = shalt.err (!%p165_p4)
}
 0x23a   :  { %s177_s11 = smov [#allocation7]  }
 0x23b   :  { %92 = dma.smem_to_hbm %s177_s11, 16, %s236_s2, [#allocation4]  }
 0x23c   :  { %173 = dma.done.wait [#allocation4], 16  }
 0x23d   :  { %174 = vsyncadd [#allocation4], 4294967280 }
 0x23e   :  { %96 = sfence }
 0x23f   :  { %97 = vsyncpa [#allocation3], 1 }
 0x240   :  { %98 = vsyncpa [#allocation6], 1 }
 0x241   :  { %99 = vsyncpa [#allocation4], 1 }

</bundles_post_ra>
